<compile_context>
chip_gen: v7x
topology: tpu7x:2x2x1
jax: 0.10.0
libtpu: 0.0.40
codegen_flags: <defaults>
</compile_context>

<pallas_src>
import functools

import numpy as np
import jax
import jax.numpy as jnp
from jax.experimental import pallas as pl
from jax.experimental.pallas import tpu as pltpu


def _sdpa_kernel(q_ref, k_ref, v_ref, out_ref, attn_ref, log_attn_ref,
                 *, inv_temperature):
    # Blocks: q (Bt, Qt, Dk), k (Bt, Lk, Dk), v (Bt, Lk, Dv) -- all f32 in VMEM.
    q = q_ref[...] * jnp.float32(inv_temperature)   # scale q once (cheaper than per-score div)
    k = k_ref[...]
    v = v_ref[...]

    # Batched contraction over the feature axis (no materialized k transpose).
    # Kept in f32: the kernel is memory/overhead bound, and f32 scores preserve
    # the fidelity of the *returned* attn / log_attn tensors.
    scores = jnp.einsum('bqd,bkd->bqk', q, k,
                        preferred_element_type=jnp.float32)     # (Bt, Qt, Lk)

    # Numerically-stable softmax / log-softmax over the key axis (torch dim=2).
    m = jnp.max(scores, axis=-1, keepdims=True)
    s = scores - m
    e = jnp.exp(s)
    denom = jnp.sum(e, axis=-1, keepdims=True)                  # (Bt, Qt, 1)
    attn = e / denom                                            # exact divide (accuracy)
    log_attn = s - jnp.log(denom)

    # output = attn @ v   (dropout skipped: eval mode)
    out = jnp.einsum('bqk,bkd->bqd', attn, v,
                     preferred_element_type=jnp.float32)        # (Bt, Qt, Dv)

    out_ref[...] = out.astype(out_ref.dtype)
    attn_ref[...] = attn.astype(attn_ref.dtype)
    log_attn_ref[...] = log_attn.astype(log_attn_ref.dtype)


# ---------------------------------------------------------------------------
# Generation-aware sizing helpers
# ---------------------------------------------------------------------------

def _tpu_vmem_bytes():
    """Physical VMEM per TensorCore (128 MiB on v5e/v6e, 64 MiB on v7x)."""
    try:
        info = pltpu.get_tpu_info()
        cap = getattr(info, "vmem_capacity_bytes", None)
        if cap:
            return int(cap)
    except Exception:
        pass
    try:
        if "v7" in jax.devices()[0].device_kind.lower():
            return 64 * 1024 * 1024
    except Exception:
        pass
    return 128 * 1024 * 1024


def _num_tensorcores():
    """TensorCores per chip (1 on v5e/v6e, 2 on v7x)."""
    try:
        info = pltpu.get_tpu_info()
        for attr in ("num_cores", "tensor_cores_per_chip", "num_tensorcores",
                     "cores_per_chip"):
            n = getattr(info, attr, None)
            if n:
                return int(n)
    except Exception:
        pass
    try:
        if "v7" in jax.devices()[0].device_kind.lower():
            return 2
    except Exception:
        pass
    return 1


def _largest_divisor_leq(n, cap):
    cap = max(1, min(n, int(cap)))
    for d in range(cap, 0, -1):
        if n % d == 0:
            return d
    return 1


def _step_vmem_bytes(b_tile, q_tile, len_k, d_k, d_v, itemsize=4, buffers=2):
    """Double-buffered VMEM footprint of one grid step's blocks (f32)."""
    per_step = b_tile * (q_tile * d_k          # q block
                         + len_k * d_k         # k block
                         + len_k * d_v         # v block
                         + q_tile * d_v        # output block
                         + 2 * q_tile * len_k) # attn + log_attn blocks
    return buffers * per_step * itemsize


# ---------------------------------------------------------------------------
# Wrapper
# ---------------------------------------------------------------------------

def scaled_dot_product_attention2(q, k, v, *, temperature, b_tile=None, q_tile=None):
    """q: (B, Lq, Dk), k: (B, Lk, Dk), v: (B, Lk, Dv), float32.

    Returns (output, attn, log_attn) matching the PyTorch module's forward
    (dropout is identity in eval mode)."""
    sz_b, len_q, d_k = q.shape
    kb, len_k, d_k2 = k.shape
    vb, len_v, d_v = v.shape
    assert kb == sz_b and vb == sz_b and d_k2 == d_k and len_v == len_k

    vmem_cap = _tpu_vmem_bytes()
    # Usable budget for the double-buffered blocks, with headroom under physical
    # VMEM: ~96 MiB on v5e/v6e (128 MiB), ~48 MiB on v7x (64 MiB).
    vmem_budget = min(96 * 1024 * 1024, int(0.75 * vmem_cap))
    n_tc = _num_tensorcores()

    if q_tile is None:
        # Keep len_q whole unless it no longer fits VMEM; then tile it in
        # sublane-aligned chunks (>=128 rows also helps MXU utilization).
        q_tile = len_q
        while (q_tile > 8 and q_tile % 8 == 0 and
               _step_vmem_bytes(1, q_tile, len_k, d_k, d_v) > vmem_budget):
            q_tile //= 2
    assert len_q % q_tile == 0
    assert q_tile == len_q or q_tile % 8 == 0

    if b_tile is None:
        # Single-TC chips (v5e/v6e): 1 grid step over batch -- extra steps are pure
        # per-step overhead on a serial grid. v7x (2 TCs): keep 2 parallel steps so
        # both cores get work. Always a divisor of sz_b; shrink until blocks fit VMEM.
        desired_steps = 2 if (n_tc >= 2 and sz_b >= 2) else 1
        b_tile = _largest_divisor_leq(sz_b, pl.cdiv(sz_b, desired_steps))
        while (b_tile > 1 and
               _step_vmem_bytes(b_tile, q_tile, len_k, d_k, d_v) > vmem_budget):
            b_tile = _largest_divisor_leq(sz_b, b_tile - 1)
    assert sz_b % b_tile == 0, "batch must be divisible by the batch tile"

    grid = (sz_b // b_tile, len_q // q_tile)   # q axis innermost: k/v blocks stay resident

    kernel = functools.partial(_sdpa_kernel,
                               inv_temperature=float(1.0 / temperature))

    return pl.pallas_call(
        kernel,
        out_shape=(
            jax.ShapeDtypeStruct((sz_b, len_q, d_v), jnp.float32),    # output
            jax.ShapeDtypeStruct((sz_b, len_q, len_k), jnp.float32),  # attn
            jax.ShapeDtypeStruct((sz_b, len_q, len_k), jnp.float32),  # log_attn
        ),
        grid_spec=pltpu.PrefetchScalarGridSpec(
            num_scalar_prefetch=0,
            grid=grid,
            in_specs=[
                pl.BlockSpec((b_tile, q_tile, d_k), lambda b, qi: (b, qi, 0)),
                # k/v block index does not depend on the inner q-tile axis, so the
                # same block is reused across q steps (no redundant HBM reads).
                pl.BlockSpec((b_tile, len_k, d_k), lambda b, qi: (b, 0, 0)),
                pl.BlockSpec((b_tile, len_k, d_v), lambda b, qi: (b, 0, 0)),
            ],
            out_specs=[
                pl.BlockSpec((b_tile, q_tile, d_v), lambda b, qi: (b, qi, 0)),
                pl.BlockSpec((b_tile, q_tile, len_k), lambda b, qi: (b, qi, 0)),
                pl.BlockSpec((b_tile, q_tile, len_k), lambda b, qi: (b, qi, 0)),
            ],
        ),
        compiler_params=pltpu.CompilerParams(
            dimension_semantics=("parallel", "parallel"),
            vmem_limit_bytes=vmem_budget,
        ),
    )(q, k, v)


def _reference(q, k, v, temperature):
    """Pure-JAX f32 reference mirroring the PyTorch forward (eval mode)."""
    hi = jax.lax.Precision.HIGHEST
    attn_raw = jnp.einsum('bqd,bkd->bqk', q, k, precision=hi) / temperature
    log_attn = jax.nn.log_softmax(attn_raw, axis=2)
    attn = jax.nn.softmax(attn_raw, axis=2)
    out = jnp.einsum('bqk,bkd->bqd', attn, v, precision=hi)
    return out, attn, log_attn


if __name__ == "__main__":
    # Small but TPU-friendly (lane-dense) shapes: every output last dim = 128.
    sz_b, len_q, len_k, d_k, d_v = 4, 8, 128, 128, 128
    temperature = float(np.power(d_k, 0.5))

    key = jax.random.PRNGKey(0)
    kq, kk, kv = jax.random.split(key, 3)
    q = jax.random.normal(kq, (sz_b, len_q, d_k), jnp.float32)
    k = jax.random.normal(kk, (sz_b, len_k, d_k), jnp.float32)
    v = jax.random.normal(kv, (sz_b, len_k, d_v), jnp.float32)

    out, attn, log_attn = scaled_dot_product_attention2(q, k, v, temperature=temperature)
    out, attn, log_attn = jax.block_until_ready((out, attn, log_attn))

    ref_out, ref_attn, ref_log = _reference(q, k, v, temperature)

    # f32 MXU matmuls + exact softmax divide -> much tighter tolerances than before.
    np.testing.assert_allclose(np.asarray(out), np.asarray(ref_out), rtol=2e-3, atol=2e-3)
    np.testing.assert_allclose(np.asarray(attn), np.asarray(ref_attn), rtol=2e-3, atol=2e-3)
    np.testing.assert_allclose(np.asarray(log_attn), np.asarray(ref_log), rtol=2e-3, atol=2e-3)

    print("KERNEL_OK")
</pallas_src>

<mosaic_0001>
module attributes {stable_mosaic.version = 11 : i64} {
  func.func @_sdpa_kernel(%arg0: i32, %arg1: i32, %arg2: memref<4x8x128xf32, #tpu.memory_space<vmem>>, %arg3: memref<4x128x128xf32, #tpu.memory_space<vmem>>, %arg4: memref<4x128x128xf32, #tpu.memory_space<vmem>>, %arg5: memref<4x8x128xf32, #tpu.memory_space<vmem>>, %arg6: memref<4x8x128xf32, #tpu.memory_space<vmem>>, %arg7: memref<4x8x128xf32, #tpu.memory_space<vmem>>) attributes {dimension_semantics = [#tpu.dimension_semantics<parallel>, #tpu.dimension_semantics<parallel>], iteration_bounds = array<i64: 1, 1>, scalar_prefetch = 0 : i64, scratch_operands = 0 : i64, tpu.core_type = #tpu.core_type<tc>, window_params = [{transform_indices = @transform_0, window_bounds = array<i64: 4, 8, 128>}, {transform_indices = @transform_1, window_bounds = array<i64: 4, 128, 128>}, {transform_indices = @transform_2, window_bounds = array<i64: 4, 128, 128>}, {transform_indices = @transform_3, window_bounds = array<i64: 4, 8, 128>}, {transform_indices = @transform_4, window_bounds = array<i64: 4, 8, 128>}, {transform_indices = @transform_5, window_bounds = array<i64: 4, 8, 128>}]} {
    %c0 = arith.constant 0 : index
    %c0_0 = arith.constant 0 : index
    %c0_1 = arith.constant 0 : index
    %0 = vector.load %arg2[%c0, %c0_0, %c0_1] : memref<4x8x128xf32, #tpu.memory_space<vmem>>, vector<4x8x128xf32>
    %cst = arith.constant 0.0883883461 : f32
    %1 = vector.broadcast %cst : f32 to vector<4x8x128xf32>
    %2 = arith.mulf %0, %1 : vector<4x8x128xf32>
    %c0_2 = arith.constant 0 : index
    %c0_3 = arith.constant 0 : index
    %c0_4 = arith.constant 0 : index
    %3 = vector.load %arg3[%c0_2, %c0_3, %c0_4] : memref<4x128x128xf32, #tpu.memory_space<vmem>>, vector<4x128x128xf32>
    %c0_5 = arith.constant 0 : index
    %c0_6 = arith.constant 0 : index
    %c0_7 = arith.constant 0 : index
    %4 = vector.load %arg4[%c0_5, %c0_6, %c0_7] : memref<4x128x128xf32, #tpu.memory_space<vmem>>, vector<4x128x128xf32>
    "tpu.trace_start"() <{level = 10 : i32, message = "bqd,bkd->bqk"}> : () -> ()
    %cst_8 = arith.constant dense<0.000000e+00> : vector<4x8x128xf32>
    %5 = tpu.matmul %2, %3, %cst_8 {dimension_numbers = #tpu.dot_dimension_numbers<[2], [2], [1], [1], [0, 0, 0, 1, 1, 1], [0], [0]>} : vector<4x8x128xf32>, vector<4x128x128xf32>, vector<4x8x128xf32> -> vector<4x8x128xf32>
    "tpu.trace_stop"() : () -> ()
    %cst_9 = arith.constant dense<0xFF800000> : vector<4x8xf32>
    %6 = vector.multi_reduction <maximumf>, %5, %cst_9 [2] : vector<4x8x128xf32> to vector<4x8xf32>
    %7 = vector.shape_cast %6 : vector<4x8xf32> to vector<4x8x1xf32>
    %8 = vector.broadcast %7 : vector<4x8x1xf32> to vector<4x8x128xf32>
    %9 = arith.subf %5, %8 : vector<4x8x128xf32>
    %10 = math.exp %9 : vector<4x8x128xf32>
    %cst_10 = arith.constant dense<0.000000e+00> : vector<4x8xf32>
    %11 = vector.multi_reduction <add>, %10, %cst_10 [2] : vector<4x8x128xf32> to vector<4x8xf32>
    %12 = vector.shape_cast %11 : vector<4x8xf32> to vector<4x8x1xf32>
    %13 = vector.broadcast %12 : vector<4x8x1xf32> to vector<4x8x128xf32>
    %14 = arith.divf %10, %13 : vector<4x8x128xf32>
    %15 = math.log %12 : vector<4x8x1xf32>
    %16 = vector.broadcast %15 : vector<4x8x1xf32> to vector<4x8x128xf32>
    %17 = arith.subf %9, %16 : vector<4x8x128xf32>
    "tpu.trace_start"() <{level = 10 : i32, message = "bqk,bkd->bqd"}> : () -> ()
    %cst_11 = arith.constant dense<0.000000e+00> : vector<4x8x128xf32>
    %18 = tpu.matmul %14, %4, %cst_11 {dimension_numbers = #tpu.dot_dimension_numbers<[2], [1], [1], [2], [0, 0, 0, 1, 1, 2], [0], [0]>} : vector<4x8x128xf32>, vector<4x128x128xf32>, vector<4x8x128xf32> -> vector<4x8x128xf32>
    "tpu.trace_stop"() : () -> ()
    %c0_12 = arith.constant 0 : index
    %c0_13 = arith.constant 0 : index
    %c0_14 = arith.constant 0 : index
    %19 = vector.load %arg5[%c0_12, %c0_13, %c0_14] : memref<4x8x128xf32, #tpu.memory_space<vmem>>, vector<4x8x128xf32>
    tpu.vector_store %arg5[%c0_12, %c0_13, %c0_14], %18 {strides = array<i32>} : memref<4x8x128xf32, #tpu.memory_space<vmem>>, vector<4x8x128xf32>,
    %c0_15 = arith.constant 0 : index
    %c0_16 = arith.constant 0 : index
    %c0_17 = arith.constant 0 : index
    %20 = vector.load %arg6[%c0_15, %c0_16, %c0_17] : memref<4x8x128xf32, #tpu.memory_space<vmem>>, vector<4x8x128xf32>
    tpu.vector_store %arg6[%c0_15, %c0_16, %c0_17], %14 {strides = array<i32>} : memref<4x8x128xf32, #tpu.memory_space<vmem>>, vector<4x8x128xf32>,
    %c0_18 = arith.constant 0 : index
    %c0_19 = arith.constant 0 : index
    %c0_20 = arith.constant 0 : index
    %21 = vector.load %arg7[%c0_18, %c0_19, %c0_20] : memref<4x8x128xf32, #tpu.memory_space<vmem>>, vector<4x8x128xf32>
    tpu.vector_store %arg7[%c0_18, %c0_19, %c0_20], %17 {strides = array<i32>} : memref<4x8x128xf32, #tpu.memory_space<vmem>>, vector<4x8x128xf32>,
    return
  }
  func.func @transform_0(%arg0: i32, %arg1: i32) -> (i32, i32, i32) {
    %c0_i32 = arith.constant 0 : i32
    %c0_i32_0 = arith.constant 0 : i32
    return %arg0, %arg1, %c0_i32 : i32, i32, i32
  }
  func.func @transform_1(%arg0: i32, %arg1: i32) -> (i32, i32, i32) {
    %c0_i32 = arith.constant 0 : i32
    %c0_i32_0 = arith.constant 0 : i32
    %c0_i32_1 = arith.constant 0 : i32
    return %arg0, %c0_i32, %c0_i32_0 : i32, i32, i32
  }
  func.func @transform_2(%arg0: i32, %arg1: i32) -> (i32, i32, i32) {
    %c0_i32 = arith.constant 0 : i32
    %c0_i32_0 = arith.constant 0 : i32
    %c0_i32_1 = arith.constant 0 : i32
    return %arg0, %c0_i32, %c0_i32_0 : i32, i32, i32
  }
  func.func @transform_3(%arg0: i32, %arg1: i32) -> (i32, i32, i32) {
    %c0_i32 = arith.constant 0 : i32
    %c0_i32_0 = arith.constant 0 : i32
    return %arg0, %arg1, %c0_i32 : i32, i32, i32
  }
  func.func @transform_4(%arg0: i32, %arg1: i32) -> (i32, i32, i32) {
    %c0_i32 = arith.constant 0 : i32
    %c0_i32_0 = arith.constant 0 : i32
    return %arg0, %arg1, %c0_i32 : i32, i32, i32
  }
  func.func @transform_5(%arg0: i32, %arg1: i32) -> (i32, i32, i32) {
    %c0_i32 = arith.constant 0 : i32
    %c0_i32_0 = arith.constant 0 : i32
    return %arg0, %arg1, %c0_i32 : i32, i32, i32
  }
}

</mosaic_0001>

<bundles_post_ra>
// kernel: tpu_custom_call.1
= control target key start
LH: loop header
LB: loop body
LE: loop exit
PB: predicated region body
PF: predicated region fallthrough
CT: control target
= control target key end

     0   :  { %11 = vsyncpa [#allocation3], 0  ;;  %s1906_s0 = inlined_call_operand.hbm [shape: f32[4,8,128], index: 0, kind: input, shape index: {}]   ;;  %s1907_s1 = inlined_call_operand.hbm [shape: f32[4,128,128], index: 1, kind: input, shape index: {}]   ;;  %s1908_s2 = inlined_call_operand.hbm [shape: f32[4,128,128], index: 2, kind: input, shape index: {}]   ;;  %s1909_s3 = inlined_call_operand.hbm [shape: f32[4,8,128], index: 3, kind: output, shape index: {0}]   ;;  %s1910_s4 = inlined_call_operand.hbm [shape: f32[4,8,128], index: 4, kind: output, shape index: {1}]   ;;  %s1911_s5 = inlined_call_operand.hbm [shape: f32[4,8,128], index: 5, kind: output, shape index: {2}]  }
   0x1   :  { %12 = vsyncpa [#allocation6], 0 }
   0x2   :  { %13 = vsyncpa [#allocation4], 0 }
   0x3   :  { %14 = vsyncpa [#allocation10], 0  ;;  %s1648_s18 = smov [#allocation5]   ;;  %s1649_s20 = smov [#allocation2]  }
   0x4   :  { %s32_s19 = sshll.u32 %s1648_s18, 4  ;;  %s20_s21 = sshll.u32 %s1649_s20, 4  ;;  %s33_s19 = int_to_ptr.vmem [resolvable:$true] %s32_s19  ;;  %s1689_s21 = int_to_ptr.vmem [resolvable:$true] %s20_s21 }
   0x5   :  { %s1508_s24 = scalar_lea.hbm %s1907_s1, 8192 }
   0x6   :  { %p1509_p0 = scmp.ne.s32.totalorder %s1907_s1, %s1508_s24  ;;  %p1512_p1 = scmp.lt.u32.totalorder %s1508_s24, %s1907_s1 }
   0x8   :  { %p1514_p2 = pnand %p1512_p1, %p1509_p0 }
   0xa   :  { %1517 = shalt.err (!%p1514_p2)
}
   0xb   :  { %s1518_s29 = scalar_lea.vmem %s33_s19, 8192  ;;  %p1523_p4 = scmp.lt.s32.totalorder %s33_s19, %s33_s19 }
   0xc   :  { %p1519_p3 = scmp.ne.s32.totalorder %s33_s19, %s1518_s29  ;;  %p1524_p5 = scmp.lt.s32.totalorder %s1518_s29, %s1518_s29 }
   0xe   :  { %p1525_p6 = por %p1524_p5, %p1523_p4 }
  0x10   :  { %p1526_p7 = pnand %p1525_p6, %p1519_p3 }
  0x12   :  { %1529 = shalt.err (!%p1526_p7)
}
  0x13   :  { %s1650_s30 = smov 128   ;;  %s1651_s6 = smov 8  }
  0x14   :  { %38 = dma.hbm_to_vmem [thread:$0]  %s1907_s1, 8192, %s33_s19, [#allocation6], %s1650_s30, %s1650_s30, %s1651_s6  }
  0x15   :  { %s1530_s11 = scalar_lea.hbm %s1906_s0, 512 }
  0x16   :  { %p1531_p8 = scmp.ne.s32.totalorder %s1906_s0, %s1530_s11  ;;  %p1534_p9 = scmp.lt.u32.totalorder %s1530_s11, %s1906_s0 }
  0x18   :  { %p1536_p10 = pnand %p1534_p9, %p1531_p8 }
  0x1a   :  { %1539 = shalt.err (!%p1536_p10)
}
  0x1b   :  { %s1540_s16 = scalar_lea.vmem %s1689_s21, 512  ;;  %p1545_p12 = scmp.lt.s32.totalorder %s1689_s21, %s1689_s21 }
  0x1c   :  { %p1541_p11 = scmp.ne.s32.totalorder %s1689_s21, %s1540_s16  ;;  %p1546_p13 = scmp.lt.s32.totalorder %s1540_s16, %s1540_s16 }
  0x1e   :  { %p1547_p0 = por %p1546_p13, %p1545_p12 }
  0x20   :  { %p1548_p1 = pnand %p1547_p0, %p1541_p11 }
  0x22   :  { %1551 = shalt.err (!%p1548_p1)
}
  0x23   :  { %26 = dma.hbm_to_vmem [thread:$0]  %s1906_s0, 512, %s1689_s21, [#allocation3], %s1650_s30, %s1650_s30, %s1651_s6  }
  0x24   :  { %s1652_s18 = smov [#allocation7]   ;;  %s1552_s23 = scalar_lea.hbm %s1908_s2, 8192 }
  0x25   :  { %s44_s19 = sshll.u32 %s1652_s18, 4  ;;  %p1553_p2 = scmp.ne.s32.totalorder %s1908_s2, %s1552_s23  ;;  %s45_s19 = int_to_ptr.vmem [resolvable:$true] %s44_s19 }
  0x26   :  { %p1556_p3 = scmp.lt.u32.totalorder %s1552_s23, %s1908_s2 }
  0x28   :  { %p1558_p4 = pnand %p1556_p3, %p1553_p2 }
  0x2a   :  { %1561 = shalt.err (!%p1558_p4)
}
  0x2b   :  { %s1562_s28 = scalar_lea.vmem %s45_s19, 8192  ;;  %p1567_p6 = scmp.lt.s32.totalorder %s45_s19, %s45_s19 }
  0x2c   :  { %p1563_p5 = scmp.ne.s32.totalorder %s45_s19, %s1562_s28  ;;  %p1568_p7 = scmp.lt.s32.totalorder %s1562_s28, %s1562_s28 }
  0x2e   :  { %p1569_p8 = por %p1568_p7, %p1567_p6 }
  0x30   :  { %p1570_p9 = pnand %p1569_p8, %p1563_p5 }
  0x32   :  { %1573 = shalt.err (!%p1570_p9)
}
  0x33   :  { %50 = dma.hbm_to_vmem [thread:$0]  %s1908_s2, 8192, %s45_s19, [#allocation6], %s1650_s30, %s1650_s30, %s1651_s6  }
  0x34   :  { %1640 = dma.done.wait [#allocation3], 512  }
  0x35   :  { %1641 = vsyncadd [#allocation3], 4294966784 }
  0x36   :  { %1642 = dma.done.wait [#allocation6], 16384  }
  0x37   :  { %1643 = vsyncadd [#allocation6], 4294950912  ;;  %v1653_v0 = vmov 0.0|0.0   ;;  %vm1654_vm0 = vmmov 0   ;;  %v1655_v1 = vmov 0.0   ;;  %v68_v2 = vld [vmem:[#allocation5] sm:$0xff] }
  0x38   :  { %1281 = vmatprep.subr.bf16.mxu0 %v1653_v0  ;;  %1305 = vmatprep.subr.bf16.mxu1 %v1653_v0  ;;  %v69_v3 = vld [vmem:[#allocation5 + $0x8] sm:$0xff]  ;;  %v84_v4 = vld [vmem:[#allocation5 + $0x80] sm:$0xff]  ;;  %v70_v8 = vld [vmem:[#allocation5 + $0x10] sm:$0xff]  ;;  %s1656_s2 = smov [#allocation9]  }
  0x39   :  { %1033 = vmatprep.mubr.msk.f32.mxu0 %vm1654_vm0, %v1655_v1  ;;  %1068 = vmatprep.mubr.msk.f32.mxu1 %vm1654_vm0, %v1655_v1  ;;  %v1282_v5 = vpack.c.bf16 %v69_v3, %v68_v2  ;;  %v85_v6 = vld [vmem:[#allocation5 + $0x88] sm:$0xff]  ;;  %v71_v9 = vld [vmem:[#allocation5 + $0x18] sm:$0xff]  ;;  %v86_v10 = vld [vmem:[#allocation5 + $0x90] sm:$0xff]  ;;  %s833_s29 = sshll.u32 %s1656_s2, 4  ;;  %s834_s29 = int_to_ptr.vmem [resolvable:$true] %s833_s29 }
  0x3a   :  { %v1306_v7 = vpack.c.bf16 %v85_v6, %v84_v4  ;;  %v87_v11 = vld [vmem:[#allocation5 + $0x98] sm:$0xff]  ;;  %v1285_v12 = vpack.c.bf16 %v71_v9, %v70_v8  ;;  %v72_v14 = vld [vmem:[#allocation5 + $0x20] sm:$0xff]  ;;  %v73_v15 = vld [vmem:[#allocation5 + $0x28] sm:$0xff]  ;;  %s1574_s7 = scalar_lea.vmem %s834_s29, 512  ;;  %p1579_p11 = scmp.lt.s32.totalorder %s834_s29, %s834_s29 }
  0x3b   :  { %1283 = vmatpush3.bf16.xpose.msra.mxu0 %v1282_v5  ;;  %v1309_v13 = vpack.c.bf16 %v87_v11, %v86_v10  ;;  %v88_v16 = vld [vmem:[#allocation5 + $0xa0] sm:$0xff]  ;;  %v89_v17 = vld [vmem:[#allocation5 + $0xa8] sm:$0xff]  ;;  %v1288_v18 = vpack.c.bf16 %v73_v15, %v72_v14  ;;  %v74_v20 = vld [vmem:[#allocation5 + $0x30] sm:$0xff]  ;;  %p1575_p10 = scmp.ne.s32.totalorder %s834_s29, %s1574_s7  ;;  %p1580_p12 = scmp.lt.s32.totalorder %s1574_s7, %s1574_s7 }
  0x3c   :  { %1307 = vmatpush3.bf16.xpose.msra.mxu1 %v1306_v7  ;;  %1284 = vmatprep.subr.bf16.mxu0 %v1653_v0  ;;  %v1312_v19 = vpack.c.bf16 %v89_v17, %v88_v16  ;;  %v75_v21 = vld [vmem:[#allocation5 + $0x38] sm:$0xff]  ;;  %v90_v22 = vld [vmem:[#allocation5 + $0xb0] sm:$0xff]  ;;  %v76_v26 = vld [vmem:[#allocation5 + $0x40] sm:$0xff] }
  0x3d   :  { %1308 = vmatprep.subr.bf16.mxu1 %v1653_v0  ;;  %v91_v23 = vld [vmem:[#allocation5 + $0xb8] sm:$0xff]  ;;  %v1291_v24 = vpack.c.bf16 %v75_v21, %v74_v20  ;;  %v77_v27 = vld [vmem:[#allocation5 + $0x48] sm:$0xff]  ;;  %v92_v28 = vld [vmem:[#allocation5 + $0xc0] sm:$0xff]  ;;  %p1581_p13 = por %p1580_p12, %p1579_p11 }
  0x3e   :  { %v1315_v25 = vpack.c.bf16 %v91_v23, %v90_v22  ;;  %v93_v29 = vld [vmem:[#allocation5 + $0xc8] sm:$0xff]  ;;  %v1294_v30 = vpack.c.bf16 %v77_v27, %v76_v26  ;;  %v78_v32 = vld [vmem:[#allocation5 + $0x50] sm:$0xff]  ;;  %v79_v33 = vld [vmem:[#allocation5 + $0x58] sm:$0xff] }
  0x3f   :  { %v1318_v31 = vpack.c.bf16 %v93_v29, %v92_v28  ;;  %v94_v34 = vld [vmem:[#allocation5 + $0xd0] sm:$0xff]  ;;  %v95_v35 = vld [vmem:[#allocation5 + $0xd8] sm:$0xff]  ;;  %v1297_v36 = vpack.c.bf16 %v79_v33, %v78_v32  ;;  %v80_v38 = vld [vmem:[#allocation5 + $0x60] sm:$0xff]  ;;  %p1582_p0 = pnand %p1581_p13, %p1575_p10 }
  0x40   :  { %v1321_v37 = vpack.c.bf16 %v95_v35, %v94_v34  ;;  %v81_v39 = vld [vmem:[#allocation5 + $0x68] sm:$0xff]  ;;  %v96_v40 = vld [vmem:[#allocation5 + $0xe0] sm:$0xff]  ;;  %v82_v44 = vld [vmem:[#allocation5 + $0x70] sm:$0xff] }
  0x41   :  { %v97_v41 = vld [vmem:[#allocation5 + $0xe8] sm:$0xff]  ;;  %v1300_v42 = vpack.c.bf16 %v81_v39, %v80_v38  ;;  %v83_v45 = vld [vmem:[#allocation5 + $0x78] sm:$0xff]  ;;  %v98_v46 = vld [vmem:[#allocation5 + $0xf0] sm:$0xff] }
  0x42   :  { %v1324_v43 = vpack.c.bf16 %v97_v41, %v96_v40  ;;  %v99_v47 = vld [vmem:[#allocation5 + $0xf8] sm:$0xff]  ;;  %v1303_v48 = vpack.c.bf16 %v83_v45, %v82_v44  ;;  %v60_v50 = vld [vmem:[#allocation2] sm:$0xff]  ;;  %v101_v52 = vld [vmem:[#allocation5 + $0x108] sm:$0xff] }
  0x43   :  { %1286 = vmatpush3.bf16.xpose.msra.mxu0 %v1285_v12  ;;  %v1327_v49 = vpack.c.bf16 %v99_v47, %v98_v46  ;;  %v100_v51 = vld [vmem:[#allocation5 + $0x100] sm:$0xff]  ;;  %v61_v53 = vld [vmem:[#allocation2 + $0x8] sm:$0xff]  ;;  %v64_v56 = vmul.f32 0.088388346, %v60_v50  ;;  %v102_v60 = vld [vmem:[#allocation5 + $0x110] sm:$0xff] }
  0x44   :  { %1310 = vmatpush3.bf16.xpose.msra.mxu1 %v1309_v13  ;;  %1287 = vmatprep.subr.bf16.mxu0 %v1653_v0  ;;  %v116_v54 = vld [vmem:[#allocation5 + $0x180] sm:$0xff]  ;;  %v117_v55 = vld [vmem:[#allocation5 + $0x188] sm:$0xff]  ;;  %v1330_v57 = vpack.c.bf16 %v101_v52, %v100_v51  ;;  %v65_v58 = vmul.f32 0.088388346, %v61_v53  ;;  %v103_v61 = vld [vmem:[#allocation5 + $0x118] sm:$0xff] }
  0x45   :  { %1311 = vmatprep.subr.bf16.mxu1 %v1653_v0  ;;  %v1354_v59 = vpack.c.bf16 %v117_v55, %v116_v54  ;;  %v118_v62 = vld [vmem:[#allocation5 + $0x190] sm:$0xff]  ;;  %v119_v63 = vld [vmem:[#allocation5 + $0x198] sm:$0xff]  ;;  %v1333_v2 = vpack.c.bf16 %v103_v61, %v102_v60  ;;  %v104_v4 = vld [vmem:[#allocation5 + $0x120] sm:$0xff] }
  0x46   :  { %v1357_v3 = vpack.c.bf16 %v119_v63, %v118_v62  ;;  %v105_v5 = vld [vmem:[#allocation5 + $0x128] sm:$0xff]  ;;  %v120_v6 = vld [vmem:[#allocation5 + $0x1a0] sm:$0xff]  ;;  %v106_v10 = vld [vmem:[#allocation5 + $0x130] sm:$0xff] }
  0x47   :  { %v121_v7 = vld [vmem:[#allocation5 + $0x1a8] sm:$0xff]  ;;  %v1336_v8 = vpack.c.bf16 %v105_v5, %v104_v4  ;;  %v107_v11 = vld [vmem:[#allocation5 + $0x138] sm:$0xff]  ;;  %v122_v12 = vld [vmem:[#allocation5 + $0x1b0] sm:$0xff] }
  0x48   :  { %v1360_v9 = vpack.c.bf16 %v121_v7, %v120_v6  ;;  %v123_v13 = vld [vmem:[#allocation5 + $0x1b8] sm:$0xff]  ;;  %v1339_v14 = vpack.c.bf16 %v107_v11, %v106_v10  ;;  %v108_v16 = vld [vmem:[#allocation5 + $0x140] sm:$0xff]  ;;  %v109_v17 = vld [vmem:[#allocation5 + $0x148] sm:$0xff] }
  0x49   :  { %v1363_v15 = vpack.c.bf16 %v123_v13, %v122_v12  ;;  %v1342_v20 = vpack.c.bf16 %v109_v17, %v108_v16  ;;  %v110_v22 = vld [vmem:[#allocation5 + $0x150] sm:$0xff]  ;;  %v111_v23 = vld [vmem:[#allocation5 + $0x158] sm:$0xff]  ;;  %v112_v28 = vld [vmem:[#allocation5 + $0x160] sm:$0xff] }
  0x4a   :  { %v1345_v26 = vpack.c.bf16 %v111_v23, %v110_v22  ;;  %v113_v29 = vld [vmem:[#allocation5 + $0x168] sm:$0xff]  ;;  %v114_v34 = vld [vmem:[#allocation5 + $0x170] sm:$0xff]  ;;  %v115_v35 = vld [vmem:[#allocation5 + $0x178] sm:$0xff] }
  0x4b   :  { %1289 = vmatpush3.bf16.xpose.msra.mxu0 %v1288_v18  ;;  %v124_v18 = vld [vmem:[#allocation5 + $0x1c0] sm:$0xff]  ;;  %v1348_v32 = vpack.c.bf16 %v113_v29, %v112_v28  ;;  %v1351_v38 = vpack.c.bf16 %v115_v35, %v114_v34  ;;  %v62_v40 = vld [vmem:[#allocation2 + $0x10] sm:$0xff]  ;;  %v63_v41 = vld [vmem:[#allocation2 + $0x18] sm:$0xff] }
  0x4c   :  { %1313 = vmatpush3.bf16.xpose.msra.mxu1 %v1312_v19  ;;  %1290 = vmatprep.subr.bf16.mxu0 %v1653_v0  ;;  %v125_v19 = vld [vmem:[#allocation5 + $0x1c8] sm:$0xff]  ;;  %v132_v52 = vld [vmem:[#allocation7] sm:$0xff]  ;;  %v134_v54 = vld [vmem:[#allocation7 + $0x10] sm:$0xff] }
  0x4d   :  { %1314 = vmatprep.subr.bf16.mxu1 %v1653_v0  ;;  %v1366_v21 = vpack.c.bf16 %v125_v19, %v124_v18  ;;  %v133_v53 = vld [vmem:[#allocation7 + $0x8] sm:$0xff]  ;;  %v150_v60 = vld [vmem:[#allocation7 + $0x90] sm:$0xff]  ;;  %v151_v62 = vld [vmem:[#allocation7 + $0x98] sm:$0xff] }
  0x4e   :  { %v1378_v55 = vpack.c.bf16 %v133_v53, %v132_v52  ;;  %v136_v63 = vld [vmem:[#allocation7 + $0x20] sm:$0xff]  ;;  %v153_v5 = vld [vmem:[#allocation7 + $0xa8] sm:$0xff]  ;;  %v138_v7 = vld [vmem:[#allocation7 + $0x30] sm:$0xff] }
  0x4f   :  { %v152_v4 = vld [vmem:[#allocation7 + $0xa0] sm:$0xff]  ;;  %v154_v10 = vld [vmem:[#allocation7 + $0xb0] sm:$0xff]  ;;  %v155_v11 = vld [vmem:[#allocation7 + $0xb8] sm:$0xff] }
  0x50   :  { %v140_v13 = vld [vmem:[#allocation7 + $0x40] sm:$0xff]  ;;  %v157_v29 = vld [vmem:[#allocation7 + $0xc8] sm:$0xff]  ;;  %v159_v35 = vld [vmem:[#allocation7 + $0xd8] sm:$0xff] }
  0x53   :  { %1292 = vmatpush3.bf16.xpose.msra.mxu0 %v1291_v24  ;;  %v126_v24 = vld [vmem:[#allocation5 + $0x1d0] sm:$0xff] }
  0x54   :  { %1316 = vmatpush3.bf16.xpose.msra.mxu1 %v1315_v25  ;;  %1293 = vmatprep.subr.bf16.mxu0 %v1653_v0  ;;  %v127_v25 = vld [vmem:[#allocation5 + $0x1d8] sm:$0xff] }
  0x55   :  { %1317 = vmatprep.subr.bf16.mxu1 %v1653_v0  ;;  %v1369_v27 = vpack.c.bf16 %v127_v25, %v126_v24  ;;  %v142_v25 = vld [vmem:[#allocation7 + $0x50] sm:$0xff] }
  0x5b   :  { %1295 = vmatpush3.bf16.xpose.msra.mxu0 %v1294_v30  ;;  %v128_v30 = vld [vmem:[#allocation5 + $0x1e0] sm:$0xff] }
  0x5c   :  { %1319 = vmatpush3.bf16.xpose.msra.mxu1 %v1318_v31  ;;  %1296 = vmatprep.subr.bf16.mxu0 %v1653_v0  ;;  %v129_v31 = vld [vmem:[#allocation5 + $0x1e8] sm:$0xff] }
  0x5d   :  { %1320 = vmatprep.subr.bf16.mxu1 %v1653_v0  ;;  %v1372_v33 = vpack.c.bf16 %v129_v31, %v128_v30  ;;  %v144_v31 = vld [vmem:[#allocation7 + $0x60] sm:$0xff] }
  0x63   :  { %1298 = vmatpush3.bf16.xpose.msra.mxu0 %v1297_v36  ;;  %v130_v36 = vld [vmem:[#allocation5 + $0x1f0] sm:$0xff] }
  0x64   :  { %1322 = vmatpush3.bf16.xpose.msra.mxu1 %v1321_v37  ;;  %1299 = vmatprep.subr.bf16.mxu0 %v1653_v0  ;;  %v131_v37 = vld [vmem:[#allocation5 + $0x1f8] sm:$0xff] }
  0x65   :  { %1323 = vmatprep.subr.bf16.mxu1 %v1653_v0  ;;  %v1375_v39 = vpack.c.bf16 %v131_v37, %v130_v36  ;;  %v146_v37 = vld [vmem:[#allocation7 + $0x70] sm:$0xff] }
  0x6b   :  { %1301 = vmatpush3.bf16.xpose.msra.mxu0 %v1300_v42  ;;  %v66_v42 = vmul.f32 0.088388346, %v62_v40 }
  0x6c   :  { %1325 = vmatpush3.bf16.xpose.msra.mxu1 %v1324_v43  ;;  %1302 = vmatprep.subr.bf16.mxu0 %v1653_v0  ;;  %v67_v43 = vmul.f32 0.088388346, %v63_v41  ;;  %v161_v41 = vld [vmem:[#allocation7 + $0xe8] sm:$0xff] }
  0x6d   :  { %1326 = vmatprep.subr.bf16.mxu1 %v1653_v0 }
  0x73   :  { %1304 = vmatpush3.bf16.xpose.msra.mxu0 %v1303_v48 }
  0x74   :  { %1328 = vmatpush3.bf16.xpose.msra.mxu1 %v1327_v49  ;;  %1329 = vmatprep.subr.bf16.mxu0 %v1653_v0 }
  0x75   :  { %1353 = vmatprep.subr.bf16.mxu1 %v1653_v0 }
  0x7a   :  { %1034 = vmatmul.mubr.f32.vlgmr.msra.gmra.mrb[0].mxu0 %v64_v56  ;;  %v135_v56 = vld [vmem:[#allocation7 + $0x18] sm:$0xff] }
  0x7b   :  { %1331 = vmatpush3.bf16.xpose.msra.mxu0 %v1330_v57  ;;  %1069 = vmatmul.mubr.f32.vlgmr.msra.gmra.mrb[0].mxu1 %v65_v58  ;;  %v148_v57 = vld [vmem:[#allocation7 + $0x80] sm:$0xff]  ;;  %v149_v58 = vld [vmem:[#allocation7 + $0x88] sm:$0xff]  ;;  %v1381_v61 = vpack.c.bf16 %v135_v56, %v134_v54 }
  0x7c   :  { %1355 = vmatpush3.bf16.xpose.msra.mxu1 %v1354_v59  ;;  %1332 = vmatprep.subr.bf16.mxu0 %v1653_v0  ;;  %v1402_v59 = vpack.c.bf16 %v149_v58, %v148_v57  ;;  %v164_v57 = vld [vmem:[#allocation7 + $0x100] sm:$0xff] }
  0x7d   :  { %1356 = vmatprep.subr.bf16.mxu1 %v1653_v0  ;;  %1103 = vmatprep.mubr.msk.f32.mxu0 %vm1654_vm0, %v1655_v1 }
  0x7e   :  { %1138 = vmatprep.mubr.msk.f32.mxu1 %vm1654_vm0, %v1655_v1 }
  0x83   :  { %1334 = vmatpush3.bf16.xpose.msra.mxu0 %v1333_v2  ;;  %v137_v2 = vld [vmem:[#allocation7 + $0x28] sm:$0xff] }
  0x84   :  { %1358 = vmatpush3.bf16.xpose.msra.mxu1 %v1357_v3  ;;  %1335 = vmatprep.subr.bf16.mxu0 %v1653_v0  ;;  %v1405_v3 = vpack.c.bf16 %v151_v62, %v150_v60  ;;  %v1384_v6 = vpack.c.bf16 %v137_v2, %v136_v63  ;;  %v166_v60 = vld [vmem:[#allocation7 + $0x110] sm:$0xff]  ;;  %v167_v63 = vld [vmem:[#allocation7 + $0x118] sm:$0xff]  ;;  %v180_v2 = vld [vmem:[#allocation7 + $0x180] sm:$0xff] }
  0x85   :  { %1359 = vmatprep.subr.bf16.mxu1 %v1653_v0 }
  0x8b   :  { %1337 = vmatpush3.bf16.xpose.msra.mxu0 %v1336_v8  ;;  %v139_v8 = vld [vmem:[#allocation7 + $0x38] sm:$0xff] }
  0x8c   :  { %1361 = vmatpush3.bf16.xpose.msra.mxu1 %v1360_v9  ;;  %1338 = vmatprep.subr.bf16.mxu0 %v1653_v0  ;;  %v1408_v9 = vpack.c.bf16 %v153_v5, %v152_v4  ;;  %v1387_v12 = vpack.c.bf16 %v139_v8, %v138_v7  ;;  %v1429_v7 = vpack.c.bf16 %v167_v63, %v166_v60 }
  0x8d   :  { %1362 = vmatprep.subr.bf16.mxu1 %v1653_v0 }
  0x93   :  { %1340 = vmatpush3.bf16.xpose.msra.mxu0 %v1339_v14  ;;  %v141_v14 = vld [vmem:[#allocation7 + $0x48] sm:$0xff] }
  0x94   :  { %1364 = vmatpush3.bf16.xpose.msra.mxu1 %v1363_v15  ;;  %1341 = vmatprep.subr.bf16.mxu0 %v1653_v0  ;;  %v1411_v15 = vpack.c.bf16 %v155_v11, %v154_v10  ;;  %v1390_v16 = vpack.c.bf16 %v141_v14, %v140_v13  ;;  %v182_v13 = vld [vmem:[#allocation7 + $0x190] sm:$0xff]  ;;  %v183_v14 = vld [vmem:[#allocation7 + $0x198] sm:$0xff] }
  0x95   :  { %1365 = vmatprep.subr.bf16.mxu1 %v1653_v0 }
  0x9b   :  { %1343 = vmatpush3.bf16.xpose.msra.mxu0 %v1342_v20 }
  0x9c   :  { %1367 = vmatpush3.bf16.xpose.msra.mxu1 %v1366_v21  ;;  %1344 = vmatprep.subr.bf16.mxu0 %v1653_v0 }
  0x9d   :  { %1368 = vmatprep.subr.bf16.mxu1 %v1653_v0 }
  0xa3   :  { %1346 = vmatpush3.bf16.xpose.msra.mxu0 %v1345_v26  ;;  %v143_v26 = vld [vmem:[#allocation7 + $0x58] sm:$0xff] }
  0xa4   :  { %1370 = vmatpush3.bf16.xpose.msra.mxu1 %v1369_v27  ;;  %1347 = vmatprep.subr.bf16.mxu0 %v1653_v0  ;;  %v156_v27 = vld [vmem:[#allocation7 + $0xc0] sm:$0xff]  ;;  %v1393_v28 = vpack.c.bf16 %v143_v26, %v142_v25  ;;  %v173_v26 = vld [vmem:[#allocation7 + $0x148] sm:$0xff] }
  0xa5   :  { %1371 = vmatprep.subr.bf16.mxu1 %v1653_v0  ;;  %v1414_v30 = vpack.c.bf16 %v157_v29, %v156_v27  ;;  %v172_v25 = vld [vmem:[#allocation7 + $0x140] sm:$0xff]  ;;  %v186_v27 = vld [vmem:[#allocation7 + $0x1b0] sm:$0xff] }
  0xa6   :  { %v1438_v29 = vpack.c.bf16 %v173_v26, %v172_v25 }
  0xab   :  { %1349 = vmatpush3.bf16.xpose.msra.mxu0 %v1348_v32  ;;  %v145_v32 = vld [vmem:[#allocation7 + $0x68] sm:$0xff] }
  0xac   :  { %1373 = vmatpush3.bf16.xpose.msra.mxu1 %v1372_v33  ;;  %1350 = vmatprep.subr.bf16.mxu0 %v1653_v0  ;;  %v158_v33 = vld [vmem:[#allocation7 + $0xd0] sm:$0xff]  ;;  %v1396_v34 = vpack.c.bf16 %v145_v32, %v144_v31  ;;  %v188_v32 = vld [vmem:[#allocation7 + $0x1c0] sm:$0xff] }
  0xad   :  { %1374 = vmatprep.subr.bf16.mxu1 %v1653_v0  ;;  %v1417_v36 = vpack.c.bf16 %v159_v35, %v158_v33  ;;  %v174_v31 = vld [vmem:[#allocation7 + $0x150] sm:$0xff]  ;;  %v189_v33 = vld [vmem:[#allocation7 + $0x1c8] sm:$0xff] }
  0xae   :  { %v1462_v35 = vpack.c.bf16 %v189_v33, %v188_v32 }
  0xb3   :  { %1352 = vmatpush3.bf16.xpose.msra.mxu0 %v1351_v38  ;;  %v147_v38 = vld [vmem:[#allocation7 + $0x78] sm:$0xff] }
  0xb4   :  { %1376 = vmatpush3.bf16.xpose.msra.mxu1 %v1375_v39  ;;  %1377 = vmatprep.subr.bf16.mxu0 %v1653_v0  ;;  %v160_v39 = vld [vmem:[#allocation7 + $0xe0] sm:$0xff]  ;;  %v1399_v40 = vpack.c.bf16 %v147_v38, %v146_v37  ;;  %v177_v37 = vld [vmem:[#allocation7 + $0x168] sm:$0xff]  ;;  %v190_v38 = vld [vmem:[#allocation7 + $0x1d0] sm:$0xff] }
  0xb5   :  { %1401 = vmatprep.subr.bf16.mxu1 %v1653_v0 }
  0xba   :  { %1104 = vmatmul.mubr.f32.vlgmr.msra.gmra.mrb[2].mxu0 %v66_v42  ;;  %v1420_v42 = vpack.c.bf16 %v161_v41, %v160_v39  ;;  %v191_v39 = vld [vmem:[#allocation7 + $0x1d8] sm:$0xff] }
  0xbb   :  { %1139 = vmatmul.mubr.f32.vlgmr.msra.gmra.mrb[2].mxu1 %v67_v43  ;;  %1173 = vmatprep.mubr.msk.f32.mxu0 %vm1654_vm0, %v1655_v1  ;;  %v162_v43 = vld [vmem:[#allocation7 + $0xf0] sm:$0xff]  ;;  %v1465_v41 = vpack.c.bf16 %v191_v39, %v190_v38 }
  0xbc   :  { %1208 = vmatprep.mubr.msk.f32.mxu1 %vm1654_vm0, %v1655_v1  ;;  %1379 = vmatpush3.bf16.msra.mxu0 %v1378_v55 }
  0xbd   :  { %1380 = vmatprep.subr.bf16.mxu0 %v1653_v0  ;;  %1403 = vmatpush3.bf16.msra.mxu1 %v1402_v59 }
  0xbe   :  { %1404 = vmatprep.subr.bf16.mxu1 %v1653_v0 }
  0xc0   :  { %1382 = vmatpush3.bf16.msra.mxu0 %v1381_v61 }
  0xc1   :  { %1383 = vmatprep.subr.bf16.mxu0 %v1653_v0  ;;  %1406 = vmatpush3.bf16.msra.mxu1 %v1405_v3  ;;  %v181_v3 = vld [vmem:[#allocation7 + $0x188] sm:$0xff] }
  0xc2   :  { %1407 = vmatprep.subr.bf16.mxu1 %v1653_v0  ;;  %v1450_v8 = vpack.c.bf16 %v181_v3, %v180_v2 }
  0xc4   :  { %1385 = vmatpush3.bf16.msra.mxu0 %v1384_v6 }
  0xc5   :  { %1386 = vmatprep.subr.bf16.mxu0 %v1653_v0  ;;  %1409 = vmatpush3.bf16.msra.mxu1 %v1408_v9  ;;  %v168_v9 = vld [vmem:[#allocation7 + $0x120] sm:$0xff] }
  0xc6   :  { %1410 = vmatprep.subr.bf16.mxu1 %v1653_v0 }
  0xc8   :  { %1388 = vmatpush3.bf16.msra.mxu0 %v1387_v12  ;;  %v169_v12 = vld [vmem:[#allocation7 + $0x128] sm:$0xff] }
  0xc9   :  { %1389 = vmatprep.subr.bf16.mxu0 %v1653_v0  ;;  %1412 = vmatpush3.bf16.msra.mxu1 %v1411_v15 }
  0xca   :  { %1413 = vmatprep.subr.bf16.mxu1 %v1653_v0 }
  0xcc   :  { %1391 = vmatpush3.bf16.msra.mxu0 %v1390_v16 }
  0xcd   :  { %1392 = vmatprep.subr.bf16.mxu0 %v1653_v0  ;;  %1415 = vmatpush3.bf16.msra.mxu1 %v1414_v30 }
  0xce   :  { %1416 = vmatprep.subr.bf16.mxu1 %v1653_v0 }
  0xd0   :  { %1394 = vmatpush3.bf16.msra.mxu0 %v1393_v28  ;;  %v187_v28 = vld [vmem:[#allocation7 + $0x1b8] sm:$0xff] }
  0xd1   :  { %1395 = vmatprep.subr.bf16.mxu0 %v1653_v0  ;;  %1418 = vmatpush3.bf16.msra.mxu1 %v1417_v36  ;;  %v1459_v30 = vpack.c.bf16 %v187_v28, %v186_v27  ;;  %v176_v36 = vld [vmem:[#allocation7 + $0x160] sm:$0xff] }
  0xd2   :  { %1419 = vmatprep.subr.bf16.mxu1 %v1653_v0 }
  0xd4   :  { %1397 = vmatpush3.bf16.msra.mxu0 %v1396_v34 }
  0xd5   :  { %1398 = vmatprep.subr.bf16.mxu0 %v1653_v0  ;;  %1421 = vmatpush3.bf16.msra.mxu1 %v1420_v42  ;;  %v178_v42 = vld [vmem:[#allocation7 + $0x170] sm:$0xff] }
  0xd6   :  { %1422 = vmatprep.subr.bf16.mxu1 %v1653_v0 }
  0xd8   :  { %1400 = vmatpush3.bf16.msra.mxu0 %v1399_v40  ;;  %v1444_v40 = vpack.c.bf16 %v177_v37, %v176_v36 }
  0xd9   :  { %1425 = vmatprep.subr.bf16.mxu0 %v1653_v0 }
 0x14d   :  { %v262_v44 = vpop.f32.mrb[0].mxu0 }
 0x14e   :  { %476 = vmax.xlane.f32.xlu0 %v262_v44  ;;  %v1035_v45 = vpop.f32.mrb[1].mxu0  ;;  %v332_v46 = vpop.f32.mrb[0].mxu1 }
 0x14f   :  { %v1070_v47 = vpop.f32.mrb[1].mxu1 }
 0x152   :  { %478 = vmax.xlane.f32.xlu0 %v332_v46 }
 0x18d   :  { %v1787_v48 = vpop.f32.mrb[2].mxu0 }
 0x18e   :  { %480 = vmax.xlane.f32.xlu1 %v1787_v48  ;;  %v1105_v49 = vpop.f32.mrb[3].mxu0  ;;  %v1790_v50 = vpop.f32.mrb[2].mxu1 }
 0x18f   :  { %v1140_v51 = vpop.f32.mrb[3].mxu1 }
 0x192   :  { %482 = vmax.xlane.f32.xlu1 %v1790_v50 }
 0x1db   :  { %v477_v17 = vpop.xlane.xlu0 %476 }
 0x1dc   :  { %v1802_v18 = vsub.f32 %v262_v44, %v477_v17  ;;  %v163_v44 = vld [vmem:[#allocation7 + $0xf8] sm:$0xff]  ;;  %v1432_v17 = vpack.c.bf16 %v169_v12, %v168_v9 }
 0x1dd   :  { %v1423_v45 = vpack.c.bf16 %v163_v44, %v162_v43  ;;  %v179_v43 = vld [vmem:[#allocation7 + $0x178] sm:$0xff]  ;;  %v192_v44 = vld [vmem:[#allocation7 + $0x1e0] sm:$0xff] }
 0x1de   :  { %v488_v19 = vmul.f32 1.442695, %v1802_v18 }
 0x1df   :  { %v479_v20 = vpop.xlane.xlu0 %478  ;;  %1424 = vmatpush3.bf16.msra.mxu1 %v1423_v45  ;;  %v193_v45 = vld [vmem:[#allocation7 + $0x1e8] sm:$0xff] }
 0x1e0   :  { %1484 = vpow2.f32 %v488_v19  ;;  %v1805_v21 = vsub.f32 %v332_v46, %v479_v20  ;;  %1449 = vmatprep.subr.bf16.mxu1 %v1653_v0  ;;  %v170_v19 = vld [vmem:[#allocation7 + $0x130] sm:$0xff]  ;;  %v171_v20 = vld [vmem:[#allocation7 + $0x138] sm:$0xff] }
 0x1e2   :  { %v490_v22 = vmul.f32 1.442695, %v1805_v21 }
 0x1e4   :  { %1486 = vpow2.f32 %v490_v22  ;;  %v184_v22 = vld [vmem:[#allocation7 + $0x1a0] sm:$0xff] }
 0x1ea   :  { %v1808_v23 = vpop.eup %1484 }
 0x1eb   :  { %496 = vadd.xlane.f32.xlu0 %v1808_v23 }
 0x1ee   :  { %v1811_v24 = vpop.eup %1486 }
 0x1ef   :  { %498 = vadd.xlane.f32.xlu1 %v1811_v24 }
 0x21b   :  { %v481_v46 = vpop.xlane.xlu1 %480 }
 0x21c   :  { %v1822_v47 = vsub.f32 %v1787_v48, %v481_v46  ;;  %v1447_v46 = vpack.c.bf16 %v179_v43, %v178_v42 }
 0x21e   :  { %v492_v49 = vmul.f32 1.442695, %v1822_v47 }
 0x21f   :  { %v483_v51 = vpop.xlane.xlu1 %482 }
 0x220   :  { %1488 = vpow2.f32 %v492_v49  ;;  %v1826_v52 = vsub.f32 %v1790_v50, %v483_v51  ;;  %v165_v50 = vld [vmem:[#allocation7 + $0x108] sm:$0xff]  ;;  %v1468_v49 = vpack.c.bf16 %v193_v45, %v192_v44  ;;  %v194_v51 = vld [vmem:[#allocation7 + $0x1f0] sm:$0xff] }
 0x221   :  { %v1426_v59 = vpack.c.bf16 %v165_v50, %v164_v57 }
 0x222   :  { %v494_v53 = vmul.f32 1.442695, %v1826_v52 }
 0x224   :  { %1490 = vpow2.f32 %v494_v53  ;;  %v195_v53 = vld [vmem:[#allocation7 + $0x1f8] sm:$0xff] }
 0x22a   :  { %v1829_v54 = vpop.eup %1488 }
 0x22b   :  { %500 = vadd.xlane.f32.xlu0 %v1829_v54 }
 0x22e   :  { %v1832_v55 = vpop.eup %1490 }
 0x22f   :  { %502 = vadd.xlane.f32.xlu1 %v1832_v55 }
 0x278   :  { %v497_v48 = vpop.xlane.xlu0 %496 }
 0x279   :  { %1492 = vrcp.f32 %v497_v48 }
 0x27a   :  { %1494 = vlog2.f32 %v497_v48  ;;  %v1471_v48 = vpack.c.bf16 %v195_v53, %v194_v51 }
 0x27c   :  { %v499_v56 = vpop.xlane.xlu1 %498 }
 0x27d   :  { %1496 = vrcp.f32 %v499_v56 }
 0x27e   :  { %1498 = vlog2.f32 %v499_v56 }
 0x283   :  { %v1493_v58 = vpop.eup %1492 }
 0x284   :  { %v1495_v61 = vpop.eup %1494  ;;  %v505_v62 = vmul.f32 %v1493_v58, %v1808_v23  ;;  %v185_v23 = vld [vmem:[#allocation7 + $0x1a8] sm:$0xff] }
 0x285   :  { %v513_v4 = vmul.f32 0.6931472, %v1495_v61 }
 0x286   :  { %1174 = vmatmul.mubr.f32.vlgmr.msra.gmra.mrb[4].mxu0 %v505_v62  ;;  %808 = vst [vmem:[#allocation9] sm:$0xff] %v505_v62 }
 0x287   :  { %v1497_v5 = vpop.eup %1496  ;;  %v520_v6 = vsub.f32 %v1802_v18, %v513_v4  ;;  %1427 = vmatpush3.bf16.msra.mxu0 %v1426_v59  ;;  %1243 = vmatprep.mubr.msk.f32.mxu0 %vm1654_vm0, %v1655_v1  ;;  %v1453_v18 = vpack.c.bf16 %v183_v14, %v182_v13 }
 0x288   :  { %v1499_v10 = vpop.eup %1498  ;;  %v507_v11 = vmul.f32 %v1497_v5, %v1811_v24  ;;  %1428 = vmatprep.subr.bf16.mxu0 %v1653_v0  ;;  %v1435_v24 = vpack.c.bf16 %v171_v20, %v170_v19 }
 0x289   :  { %812 = vst [vmem:[#allocation11] sm:$0xff] %v520_v6  ;;  %v515_v15 = vmul.f32 0.6931472, %v1499_v10 }
 0x28a   :  { %1209 = vmatmul.mubr.f32.vlgmr.msra.gmra.mrb[4].mxu1 %v507_v11  ;;  %809 = vst [vmem:[#allocation9 + $0x8] sm:$0xff] %v507_v11 }
 0x28b   :  { %v521_v16 = vsub.f32 %v1805_v21, %v515_v15  ;;  %1430 = vmatpush3.bf16.msra.mxu0 %v1429_v7  ;;  %1451 = vmatpush3.bf16.msra.mxu1 %v1450_v8  ;;  %v1456_v21 = vpack.c.bf16 %v185_v23, %v184_v22 }
 0x28c   :  { %1431 = vmatprep.subr.bf16.mxu0 %v1653_v0  ;;  %1452 = vmatprep.subr.bf16.mxu1 %v1653_v0 }
 0x28d   :  { %813 = vst [vmem:[#allocation11 + $0x8] sm:$0xff] %v521_v16  ;;  %1278 = vmatprep.mubr.msk.f32.mxu1 %vm1654_vm0, %v1655_v1  ;;  %v175_v1 = vld [vmem:[#allocation7 + $0x158] sm:$0xff] }
 0x28e   :  { %v1441_v34 = vpack.c.bf16 %v175_v1, %v174_v31 }
 0x28f   :  { %1433 = vmatpush3.bf16.msra.mxu0 %v1432_v17  ;;  %1454 = vmatpush3.bf16.msra.mxu1 %v1453_v18 }
 0x290   :  { %1434 = vmatprep.subr.bf16.mxu0 %v1653_v0  ;;  %1455 = vmatprep.subr.bf16.mxu1 %v1653_v0 }
 0x293   :  { %1436 = vmatpush3.bf16.msra.mxu0 %v1435_v24  ;;  %1457 = vmatpush3.bf16.msra.mxu1 %v1456_v21 }
 0x294   :  { %1437 = vmatprep.subr.bf16.mxu0 %v1653_v0  ;;  %1458 = vmatprep.subr.bf16.mxu1 %v1653_v0 }
 0x297   :  { %1439 = vmatpush3.bf16.msra.mxu0 %v1438_v29  ;;  %1460 = vmatpush3.bf16.msra.mxu1 %v1459_v30 }
 0x298   :  { %1440 = vmatprep.subr.bf16.mxu0 %v1653_v0  ;;  %1461 = vmatprep.subr.bf16.mxu1 %v1653_v0 }
 0x29b   :  { %1442 = vmatpush3.bf16.msra.mxu0 %v1441_v34  ;;  %1463 = vmatpush3.bf16.msra.mxu1 %v1462_v35 }
 0x29c   :  { %1443 = vmatprep.subr.bf16.mxu0 %v1653_v0  ;;  %1464 = vmatprep.subr.bf16.mxu1 %v1653_v0 }
 0x29f   :  { %1445 = vmatpush3.bf16.msra.mxu0 %v1444_v40  ;;  %1466 = vmatpush3.bf16.msra.mxu1 %v1465_v41 }
 0x2a0   :  { %1446 = vmatprep.subr.bf16.mxu0 %v1653_v0  ;;  %1467 = vmatprep.subr.bf16.mxu1 %v1653_v0 }
 0x2a3   :  { %1448 = vmatpush3.bf16.msra.mxu0 %v1447_v46  ;;  %1469 = vmatpush3.bf16.msra.mxu1 %v1468_v49 }
 0x2a4   :  { %1470 = vmatprep.subr.bf16.mxu1 %v1653_v0 }
 0x2a7   :  { %1472 = vmatpush3.bf16.msra.mxu1 %v1471_v48 }
 0x2b8   :  { %v501_v56 = vpop.xlane.xlu0 %500 }
 0x2b9   :  { %1500 = vrcp.f32 %v501_v56 }
 0x2ba   :  { %1502 = vlog2.f32 %v501_v56 }
 0x2bc   :  { %v503_v57 = vpop.xlane.xlu1 %502 }
 0x2bd   :  { %1504 = vrcp.f32 %v503_v57 }
 0x2be   :  { %1506 = vlog2.f32 %v503_v57 }
 0x2c3   :  { %v1501_v50 = vpop.eup %1500 }
 0x2c4   :  { %v1503_v58 = vpop.eup %1502  ;;  %v509_v59 = vmul.f32 %v1501_v50, %v1829_v54 }
 0x2c5   :  { %v517_v60 = vmul.f32 0.6931472, %v1503_v58 }
 0x2c6   :  { %1244 = vmatmul.mubr.f32.vlgmr.msra.gmra.mrb[6].mxu0 %v509_v59  ;;  %810 = vst [vmem:[#allocation9 + $0x10] sm:$0xff] %v509_v59 }
 0x2c7   :  { %v1505_v61 = vpop.eup %1504  ;;  %v522_v62 = vsub.f32 %v1822_v47, %v517_v60 }
 0x2c8   :  { %v1507_v63 = vpop.eup %1506  ;;  %v511_v0 = vmul.f32 %v1505_v61, %v1832_v55 }
 0x2c9   :  { %814 = vst [vmem:[#allocation11 + $0x10] sm:$0xff] %v522_v62  ;;  %v519_v2 = vmul.f32 0.6931472, %v1507_v63 }
 0x2ca   :  { %1279 = vmatmul.mubr.f32.vlgmr.msra.gmra.mrb[6].mxu1 %v511_v0  ;;  %811 = vst [vmem:[#allocation9 + $0x18] sm:$0xff] %v511_v0 }
 0x2cb   :  { %v523_v3 = vsub.f32 %v1826_v52, %v519_v2 }
 0x2cd   :  { %815 = vst [vmem:[#allocation11 + $0x18] sm:$0xff] %v523_v3 }
 0x2ce   :  { %1585 = shalt.err (!%p1582_p0)
}
 0x2cf   :  { %s1586_s10 = scalar_lea.hbm %s1910_s4, 512 }
 0x2d0   :  { %p1587_p1 = scmp.ne.s32.totalorder %s1910_s4, %s1586_s10  ;;  %p1590_p2 = scmp.lt.u32.totalorder %s1586_s10, %s1910_s4 }
 0x2d2   :  { %p1592_p3 = pnand %p1590_p2, %p1587_p1 }
 0x2d4   :  { %1595 = shalt.err (!%p1592_p3)
}
 0x2d5   :  { %839 = dma.vmem_to_hbm [thread:$0]  %s834_s29, 512, %s1910_s4, [#allocation10], %s1650_s30, %s1650_s30, %s1651_s6  }
 0x2d6   :  { %s1657_s1 = smov [#allocation11]  }
 0x2d7   :  { %s845_s17 = sshll.u32 %s1657_s1, 4  ;;  %s846_s17 = int_to_ptr.vmem [resolvable:$true] %s845_s17 }
 0x2d8   :  { %s1596_s18 = scalar_lea.vmem %s846_s17, 512  ;;  %p1601_p5 = scmp.lt.s32.totalorder %s846_s17, %s846_s17 }
 0x2d9   :  { %p1597_p4 = scmp.ne.s32.totalorder %s846_s17, %s1596_s18  ;;  %p1602_p6 = scmp.lt.s32.totalorder %s1596_s18, %s1596_s18 }
 0x2db   :  { %p1603_p7 = por %p1602_p6, %p1601_p5 }
 0x2dd   :  { %p1604_p8 = pnand %p1603_p7, %p1597_p4 }
 0x2df   :  { %1607 = shalt.err (!%p1604_p8)
}
 0x2e0   :  { %s1608_s22 = scalar_lea.hbm %s1911_s5, 512 }
 0x2e1   :  { %p1609_p9 = scmp.ne.s32.totalorder %s1911_s5, %s1608_s22  ;;  %p1612_p10 = scmp.lt.u32.totalorder %s1608_s22, %s1911_s5 }
 0x2e3   :  { %p1614_p11 = pnand %p1612_p10, %p1609_p9 }
 0x2e5   :  { %1617 = shalt.err (!%p1614_p11)
}
 0x2e6   :  { %851 = dma.vmem_to_hbm [thread:$0]  %s846_s17, 512, %s1911_s5, [#allocation10], %s1650_s30, %s1650_s30, %s1651_s6  }
 0x2e7   :  { %s1658_s28 = smov [#allocation8]  }
 0x2e8   :  { %s821_s0 = sshll.u32 %s1658_s28, 4  ;;  %s822_s0 = int_to_ptr.vmem [resolvable:$true] %s821_s0 }
 0x2e9   :  { %s1618_s21 = scalar_lea.vmem %s822_s0, 512  ;;  %p1623_p13 = scmp.lt.s32.totalorder %s822_s0, %s822_s0 }
 0x2ea   :  { %p1619_p12 = scmp.ne.s32.totalorder %s822_s0, %s1618_s21  ;;  %p1624_p0 = scmp.lt.s32.totalorder %s1618_s21, %s1618_s21 }
 0x2ec   :  { %p1625_p1 = por %p1624_p0, %p1623_p13 }
 0x2ee   :  { %p1626_p2 = pnand %p1625_p1, %p1619_p12 }
 0x359   :  { %v590_v47 = vpop.f32.mrb[4].mxu0 }
 0x35a   :  { %804 = vst [vmem:[#allocation8] sm:$0xff] %v590_v47  ;;  %v1175_v52 = vpop.f32.mrb[5].mxu0 }
 0x35d   :  { %v660_v54 = vpop.f32.mrb[4].mxu1 }
 0x35e   :  { %805 = vst [vmem:[#allocation8 + $0x8] sm:$0xff] %v660_v54  ;;  %v1210_v55 = vpop.f32.mrb[5].mxu1 }
 0x399   :  { %v730_v4 = vpop.f32.mrb[6].mxu0 }
 0x39a   :  { %806 = vst [vmem:[#allocation8 + $0x10] sm:$0xff] %v730_v4  ;;  %v1245_v5 = vpop.f32.mrb[7].mxu0 }
 0x39d   :  { %v800_v6 = vpop.f32.mrb[6].mxu1 }
 0x39e   :  { %807 = vst [vmem:[#allocation8 + $0x18] sm:$0xff] %v800_v6  ;;  %v1280_v7 = vpop.f32.mrb[7].mxu1 }
 0x39f   :  { %1629 = shalt.err (!%p1626_p2)
}
 0x3a0   :  { %s1630_s29 = scalar_lea.hbm %s1909_s3, 512 }
 0x3a1   :  { %p1631_p3 = scmp.ne.s32.totalorder %s1909_s3, %s1630_s29  ;;  %p1634_p4 = scmp.lt.u32.totalorder %s1630_s29, %s1909_s3 }
 0x3a3   :  { %p1636_p5 = pnand %p1634_p4, %p1631_p3 }
 0x3a5   :  { %1639 = shalt.err (!%p1636_p5)
}
 0x3a6   :  { %827 = dma.vmem_to_hbm [thread:$0]  %s822_s0, 512, %s1909_s3, [#allocation4], %s1650_s30, %s1650_s30, %s1651_s6  }
 0x3a7   :  { %1644 = dma.done.wait [#allocation4], 512  }
 0x3a8   :  { %1645 = vsyncadd [#allocation4], 4294966784 }
 0x3a9   :  { %1646 = dma.done.wait [#allocation10], 1024  }
 0x3aa   :  { %1647 = vsyncadd [#allocation10], 4294966272 }
 0x3ab   :  { %861 = vsyncpa [#allocation3], 1 }
 0x3ac   :  { %862 = vsyncpa [#allocation6], 1 }
 0x3ad   :  { %863 = vsyncpa [#allocation4], 1 }
 0x3ae   :  { %864 = vsyncpa [#allocation10], 1 }

</bundles_post_ra>
